<compile_context>
chip_gen: v7x
topology: tpu7x:2x2x1
jax: 0.10.0
libtpu: 0.0.40
codegen_flags: <defaults>
</compile_context>

<pallas_src>
import jax
import jax.numpy as jnp
import numpy as np
from jax.experimental import pallas as pl
from jax.experimental.pallas import tpu as pltpu


def _round_up(x, m):
    return ((x + m - 1) // m) * m


def _pad2d(x, rows, cols):
    r, c = x.shape
    return jnp.pad(x, ((0, rows - r), (0, cols - c)))


def _detr_forward_kernel(src_ref, pw_ref, pb_ref,
                         hs_ref, wc_ref, bc_ref,
                         w1_ref, b1_ref, w2_ref, b2_ref, w3_ref, b3_ref,
                         proj_ref, logits_ref, boxes_ref):
    """Fused DETR heads. All refs are lane-dense (last dim a multiple of 128)."""
    f32 = jnp.float32

    # --- 1x1 conv input projection: proj = src @ Wp + bp ---------------------
    src = src_ref[...].astype(f32)
    proj = jnp.dot(src, pw_ref[...].astype(f32), preferred_element_type=f32)
    proj_ref[...] = (proj + pb_ref[...].astype(f32)).astype(proj_ref.dtype)

    # --- classification head: logits = hs @ Wc + bc --------------------------
    hs = hs_ref[...].astype(f32)
    logits = jnp.dot(hs, wc_ref[...].astype(f32), preferred_element_type=f32)
    logits_ref[...] = (logits + bc_ref[...].astype(f32)).astype(logits_ref.dtype)

    # --- bbox head: 3-layer MLP with ReLU, then sigmoid -----------------------
    h = jnp.dot(hs, w1_ref[...].astype(f32), preferred_element_type=f32)
    h = jnp.maximum(h + b1_ref[...].astype(f32), 0.0)
    h = jnp.dot(h, w2_ref[...].astype(f32), preferred_element_type=f32)
    h = jnp.maximum(h + b2_ref[...].astype(f32), 0.0)
    b = jnp.dot(h, w3_ref[...].astype(f32), preferred_element_type=f32)
    b = b + b3_ref[...].astype(f32)
    # sigmoid(x) = 1 / (1 + exp(-x)); exp and reciprocal both go to the EUP slot.
    boxes_ref[...] = pl.reciprocal(1.0 + jnp.exp(-b), approx=True).astype(boxes_ref.dtype)


def detr_forward(src, hs, params):
    """Pallas implementation of the defined part of DETR.forward.

    src: [B, Cin, H, W]  backbone feature map (input to the 1x1 projection)
    hs:  [B, Q, D]       transformer decoder output (input to the heads)
    params: torch-layout weights (Linear / 1x1-conv weight is [out, in]).

    Returns (proj [B, D, H, W], {'logits': [B, Q, C+1], 'boxes': [B, Q, 4]}).
    """
    B, Cin, H, W = src.shape
    Bh, Q, D = hs.shape
    assert B == Bh
    C1 = params["class_w"].shape[0]          # num_classes + 1

    LANE, SUB = 128, 8
    cin_p = _round_up(Cin, LANE)
    d_p = _round_up(D, LANE)
    c_p = _round_up(C1, LANE)
    box_p = LANE                             # 4 coords padded to a full 128-lane row
    n_px, n_q = B * H * W, B * Q
    npx_p = _round_up(n_px, SUB)
    nq_p = _round_up(n_q, SUB)

    # ---- lane-dense operand layouts (pad once, wrapper side) -----------------
    src2d = _pad2d(src.transpose(0, 2, 3, 1).reshape(n_px, Cin), npx_p, cin_p)
    hs2d = _pad2d(hs.reshape(n_q, D), nq_p, d_p)

    pw = _pad2d(params["input_w"].T, cin_p, d_p)
    pb = _pad2d(params["input_b"][None, :], 1, d_p)
    wc = _pad2d(params["class_w"].T, d_p, c_p)
    bc = _pad2d(params["class_b"][None, :], 1, c_p)
    w1 = _pad2d(params["bbox_w1"].T, d_p, d_p)
    b1 = _pad2d(params["bbox_b1"][None, :], 1, d_p)
    w2 = _pad2d(params["bbox_w2"].T, d_p, d_p)
    b2 = _pad2d(params["bbox_b2"][None, :], 1, d_p)
    w3 = _pad2d(params["bbox_w3"].T, d_p, box_p)
    b3 = _pad2d(params["bbox_b3"][None, :], 1, box_p)

    vmem = pl.BlockSpec(memory_space=pltpu.MemorySpace.VMEM)
    proj_pad, logits_pad, boxes_pad = pl.pallas_call(
        _detr_forward_kernel,
        out_shape=(
            jax.ShapeDtypeStruct((npx_p, d_p), jnp.float32),
            jax.ShapeDtypeStruct((nq_p, c_p), jnp.float32),
            jax.ShapeDtypeStruct((nq_p, box_p), jnp.float32),
        ),
        in_specs=[vmem] * 12,
        out_specs=(vmem, vmem, vmem),
    )(src2d, pw, pb, hs2d, wc, bc, w1, b1, w2, b2, w3, b3)

    proj = proj_pad[:n_px, :D].reshape(B, H, W, D).transpose(0, 3, 1, 2)
    logits = logits_pad[:n_q, :C1].reshape(B, Q, C1)
    boxes = boxes_pad[:n_q, :4].reshape(B, Q, 4)
    return proj, {"logits": logits, "boxes": boxes}


def detr_forward_ref(src, hs, params):
    """Pure-JAX reference mirroring the PyTorch module."""
    proj = jnp.einsum("bchw,dc->bdhw", src, params["input_w"]) \
        + params["input_b"][None, :, None, None]
    logits = hs @ params["class_w"].T + params["class_b"]
    h = jax.nn.relu(hs @ params["bbox_w1"].T + params["bbox_b1"])
    h = jax.nn.relu(h @ params["bbox_w2"].T + params["bbox_b2"])
    boxes = jax.nn.sigmoid(h @ params["bbox_w3"].T + params["bbox_b3"])
    return proj, logits, boxes


if __name__ == "__main__":
    key = jax.random.PRNGKey(0)
    B, Cin, H, W = 2, 4, 8, 8        # small backbone feature map
    Q, D = 16, 32                    # num_queries, transformer d_model
    NUM_CLASSES = 7                  # -> C+1 = 8 classes per query

    ks = jax.random.split(key, 12)
    src = jax.random.normal(ks[0], (B, Cin, H, W), jnp.float32)
    hs = jax.random.normal(ks[1], (B, Q, D), jnp.float32)

    def w(k, shape):
        return 0.1 * jax.random.normal(k, shape, jnp.float32)

    params = {
        "input_w": w(ks[2], (D, Cin)),            # Conv2d 1x1 kernel, torch layout [out, in]
        "input_b": w(ks[3], (D,)),
        "class_w": w(ks[4], (NUM_CLASSES + 1, D)),
        "class_b": w(ks[5], (NUM_CLASSES + 1,)),
        "bbox_w1": w(ks[6], (D, D)),
        "bbox_b1": w(ks[7], (D,)),
        "bbox_w2": w(ks[8], (D, D)),
        "bbox_b2": w(ks[9], (D,)),
        "bbox_w3": w(ks[10], (4, D)),
        "bbox_b3": w(ks[11], (4,)),
    }

    proj, out = jax.jit(detr_forward)(src, hs, params)
    jax.block_until_ready((proj, out))

    proj_ref, logits_ref, boxes_ref = detr_forward_ref(src, hs, params)
    np.testing.assert_allclose(np.asarray(proj), np.asarray(proj_ref), rtol=3e-2, atol=3e-2)
    np.testing.assert_allclose(np.asarray(out["logits"]), np.asarray(logits_ref),
                               rtol=3e-2, atol=3e-2)
    np.testing.assert_allclose(np.asarray(out["boxes"]), np.asarray(boxes_ref),
                               rtol=3e-2, atol=3e-2)
    assert out["logits"].shape == (B, Q, NUM_CLASSES + 1)
    assert out["boxes"].shape == (B, Q, 4)

    print("KERNEL_OK")
</pallas_src>

<mosaic_0001>
module attributes {stable_mosaic.version = 11 : i64} {
  func.func @_detr_forward_kernel(%arg0: memref<128x128xf32, #tpu.memory_space<vmem>>, %arg1: memref<128x128xf32, #tpu.memory_space<vmem>>, %arg2: memref<1x128xf32, #tpu.memory_space<vmem>>, %arg3: memref<32x128xf32, #tpu.memory_space<vmem>>, %arg4: memref<128x128xf32, #tpu.memory_space<vmem>>, %arg5: memref<1x128xf32, #tpu.memory_space<vmem>>, %arg6: memref<128x128xf32, #tpu.memory_space<vmem>>, %arg7: memref<1x128xf32, #tpu.memory_space<vmem>>, %arg8: memref<128x128xf32, #tpu.memory_space<vmem>>, %arg9: memref<1x128xf32, #tpu.memory_space<vmem>>, %arg10: memref<128x128xf32, #tpu.memory_space<vmem>>, %arg11: memref<1x128xf32, #tpu.memory_space<vmem>>, %arg12: memref<128x128xf32, #tpu.memory_space<vmem>>, %arg13: memref<32x128xf32, #tpu.memory_space<vmem>>, %arg14: memref<32x128xf32, #tpu.memory_space<vmem>>) attributes {dimension_semantics = [], scalar_prefetch = 0 : i64, scratch_operands = 0 : i64, tpu.core_type = #tpu.core_type<tc>} {
    %c0 = arith.constant 0 : index
    %c0_0 = arith.constant 0 : index
    %0 = vector.load %arg0[%c0, %c0_0] : memref<128x128xf32, #tpu.memory_space<vmem>>, vector<128x128xf32>
    %c0_1 = arith.constant 0 : index
    %c0_2 = arith.constant 0 : index
    %1 = vector.load %arg1[%c0_1, %c0_2] : memref<128x128xf32, #tpu.memory_space<vmem>>, vector<128x128xf32>
    %cst = arith.constant dense<0.000000e+00> : vector<128x128xf32>
    %2 = tpu.matmul %0, %1, %cst {dimension_numbers = #tpu.dot_dimension_numbers<[1], [0], [0], [1], [0, 0, 1, 1], [], []>} : vector<128x128xf32>, vector<128x128xf32>, vector<128x128xf32> -> vector<128x128xf32>
    %c0_3 = arith.constant 0 : index
    %c0_4 = arith.constant 0 : index
    %3 = vector.load %arg2[%c0_3, %c0_4] : memref<1x128xf32, #tpu.memory_space<vmem>>, vector<1x128xf32>
    %4 = vector.broadcast %3 : vector<1x128xf32> to vector<128x128xf32>
    %5 = arith.addf %2, %4 : vector<128x128xf32>
    %c0_5 = arith.constant 0 : index
    %c0_6 = arith.constant 0 : index
    %6 = vector.load %arg12[%c0_5, %c0_6] : memref<128x128xf32, #tpu.memory_space<vmem>>, vector<128x128xf32>
    tpu.vector_store %arg12[%c0_5, %c0_6], %5 {strides = array<i32>} : memref<128x128xf32, #tpu.memory_space<vmem>>, vector<128x128xf32>,
    %c0_7 = arith.constant 0 : index
    %c0_8 = arith.constant 0 : index
    %7 = vector.load %arg3[%c0_7, %c0_8] : memref<32x128xf32, #tpu.memory_space<vmem>>, vector<32x128xf32>
    %c0_9 = arith.constant 0 : index
    %c0_10 = arith.constant 0 : index
    %8 = vector.load %arg4[%c0_9, %c0_10] : memref<128x128xf32, #tpu.memory_space<vmem>>, vector<128x128xf32>
    %cst_11 = arith.constant dense<0.000000e+00> : vector<32x128xf32>
    %9 = tpu.matmul %7, %8, %cst_11 {dimension_numbers = #tpu.dot_dimension_numbers<[1], [0], [0], [1], [0, 0, 1, 1], [], []>} : vector<32x128xf32>, vector<128x128xf32>, vector<32x128xf32> -> vector<32x128xf32>
    %c0_12 = arith.constant 0 : index
    %c0_13 = arith.constant 0 : index
    %10 = vector.load %arg5[%c0_12, %c0_13] : memref<1x128xf32, #tpu.memory_space<vmem>>, vector<1x128xf32>
    %11 = vector.broadcast %10 : vector<1x128xf32> to vector<32x128xf32>
    %12 = arith.addf %9, %11 : vector<32x128xf32>
    %c0_14 = arith.constant 0 : index
    %c0_15 = arith.constant 0 : index
    %13 = vector.load %arg13[%c0_14, %c0_15] : memref<32x128xf32, #tpu.memory_space<vmem>>, vector<32x128xf32>
    tpu.vector_store %arg13[%c0_14, %c0_15], %12 {strides = array<i32>} : memref<32x128xf32, #tpu.memory_space<vmem>>, vector<32x128xf32>,
    %c0_16 = arith.constant 0 : index
    %c0_17 = arith.constant 0 : index
    %14 = vector.load %arg6[%c0_16, %c0_17] : memref<128x128xf32, #tpu.memory_space<vmem>>, vector<128x128xf32>
    %cst_18 = arith.constant dense<0.000000e+00> : vector<32x128xf32>
    %15 = tpu.matmul %7, %14, %cst_18 {dimension_numbers = #tpu.dot_dimension_numbers<[1], [0], [0], [1], [0, 0, 1, 1], [], []>} : vector<32x128xf32>, vector<128x128xf32>, vector<32x128xf32> -> vector<32x128xf32>
    %c0_19 = arith.constant 0 : index
    %c0_20 = arith.constant 0 : index
    %16 = vector.load %arg7[%c0_19, %c0_20] : memref<1x128xf32, #tpu.memory_space<vmem>>, vector<1x128xf32>
    %17 = vector.broadcast %16 : vector<1x128xf32> to vector<32x128xf32>
    %18 = arith.addf %15, %17 : vector<32x128xf32>
    %cst_21 = arith.constant 0.000000e+00 : f32
    %19 = vector.broadcast %cst_21 : f32 to vector<32x128xf32>
    %20 = arith.maximumf %18, %19 : vector<32x128xf32>
    %c0_22 = arith.constant 0 : index
    %c0_23 = arith.constant 0 : index
    %21 = vector.load %arg8[%c0_22, %c0_23] : memref<128x128xf32, #tpu.memory_space<vmem>>, vector<128x128xf32>
    %cst_24 = arith.constant dense<0.000000e+00> : vector<32x128xf32>
    %22 = tpu.matmul %20, %21, %cst_24 {dimension_numbers = #tpu.dot_dimension_numbers<[1], [0], [0], [1], [0, 0, 1, 1], [], []>} : vector<32x128xf32>, vector<128x128xf32>, vector<32x128xf32> -> vector<32x128xf32>
    %c0_25 = arith.constant 0 : index
    %c0_26 = arith.constant 0 : index
    %23 = vector.load %arg9[%c0_25, %c0_26] : memref<1x128xf32, #tpu.memory_space<vmem>>, vector<1x128xf32>
    %24 = vector.broadcast %23 : vector<1x128xf32> to vector<32x128xf32>
    %25 = arith.addf %22, %24 : vector<32x128xf32>
    %cst_27 = arith.constant 0.000000e+00 : f32
    %26 = vector.broadcast %cst_27 : f32 to vector<32x128xf32>
    %27 = arith.maximumf %25, %26 : vector<32x128xf32>
    %c0_28 = arith.constant 0 : index
    %c0_29 = arith.constant 0 : index
    %28 = vector.load %arg10[%c0_28, %c0_29] : memref<128x128xf32, #tpu.memory_space<vmem>>, vector<128x128xf32>
    %cst_30 = arith.constant dense<0.000000e+00> : vector<32x128xf32>
    %29 = tpu.matmul %27, %28, %cst_30 {dimension_numbers = #tpu.dot_dimension_numbers<[1], [0], [0], [1], [0, 0, 1, 1], [], []>} : vector<32x128xf32>, vector<128x128xf32>, vector<32x128xf32> -> vector<32x128xf32>
    %c0_31 = arith.constant 0 : index
    %c0_32 = arith.constant 0 : index
    %30 = vector.load %arg11[%c0_31, %c0_32] : memref<1x128xf32, #tpu.memory_space<vmem>>, vector<1x128xf32>
    %31 = vector.broadcast %30 : vector<1x128xf32> to vector<32x128xf32>
    %32 = arith.addf %29, %31 : vector<32x128xf32>
    %cst_33 = arith.constant 0.000000e+00 : f32
    %33 = vector.broadcast %cst_33 : f32 to vector<32x128xf32>
    %34 = arith.subf %33, %32 : vector<32x128xf32>
    %35 = math.exp %34 : vector<32x128xf32>
    %cst_34 = arith.constant 1.000000e+00 : f32
    %36 = vector.broadcast %cst_34 : f32 to vector<32x128xf32>
    %37 = arith.addf %36, %35 : vector<32x128xf32>
    %38 = tpu.reciprocal %37 {approx = true} : vector<32x128xf32> -> vector<32x128xf32>
    %c0_35 = arith.constant 0 : index
    %c0_36 = arith.constant 0 : index
    %39 = vector.load %arg14[%c0_35, %c0_36] : memref<32x128xf32, #tpu.memory_space<vmem>>, vector<32x128xf32>
    tpu.vector_store %arg14[%c0_35, %c0_36], %38 {strides = array<i32>} : memref<32x128xf32, #tpu.memory_space<vmem>>, vector<32x128xf32>,
    return
  }
}

</mosaic_0001>

<bundles_post_ra>
// kernel: detr_forward.1
= control target key start
LH: loop header
LB: loop body
LE: loop exit
PB: predicated region body
PF: predicated region fallthrough
CT: control target
= control target key end

     0   :  { %s1760_s0 = inlined_call_operand.vmem [shape: f32[128,128], index: 0, kind: input, shape index: {}]   ;;  %s1761_s1 = inlined_call_operand.vmem [shape: f32[128,128], index: 1, kind: input, shape index: {}]   ;;  %s1762_s2 = inlined_call_operand.vmem [shape: f32[1,128], index: 2, kind: input, shape index: {}]   ;;  %s1763_s3 = inlined_call_operand.vmem [shape: f32[32,128], index: 3, kind: input, shape index: {}]   ;;  %s1764_s4 = inlined_call_operand.vmem [shape: f32[128,128], index: 4, kind: input, shape index: {}]   ;;  %s1765_s5 = inlined_call_operand.vmem [shape: f32[1,128], index: 5, kind: input, shape index: {}]   ;;  %s1766_s6 = inlined_call_operand.vmem [shape: f32[128,128], index: 6, kind: input, shape index: {}]   ;;  %s1767_s7 = inlined_call_operand.vmem [shape: f32[1,128], index: 7, kind: input, shape index: {}]   ;;  %s1768_s8 = inlined_call_operand.vmem [shape: f32[128,128], index: 8, kind: input, shape index: {}]   ;;  %s1769_s9 = inlined_call_operand.vmem [shape: f32[1,128], index: 9, kind: input, shape index: {}]   ;;  %s1770_s10 = inlined_call_operand.vmem [shape: f32[128,128], index: 10, kind: input, shape index: {}]   ;;  %s1771_s11 = inlined_call_operand.vmem [shape: f32[1,128], index: 11, kind: input, shape index: {}]   ;;  %s1772_s12 = inlined_call_operand.hbm [shape: f32[128,128], index: 12, kind: output, shape index: {0}]   ;;  %s1773_s13 = inlined_call_operand.vmem [shape: f32[32,128], index: 13, kind: output, shape index: {1}]   ;;  %s1774_s14 = inlined_call_operand.vmem [shape: f32[32,128], index: 14, kind: output, shape index: {2}]  }
   0x1   :  { %v61_v0 = vld [vmem:[%s1761_s1] sm:$0xff]  ;;  %v62_v1 = vld [vmem:[%s1761_s1 + $0x8] sm:$0xff]  ;;  %v63_v2 = vld [vmem:[%s1761_s1 + $0x10] sm:$0xff] }
   0x2   :  { %v1066_v3 = vpack.c.bf16 %v62_v1, %v61_v0  ;;  %v64_v4 = vld [vmem:[%s1761_s1 + $0x18] sm:$0xff]  ;;  %v65_v6 = vld [vmem:[%s1761_s1 + $0x20] sm:$0xff]  ;;  %v66_v7 = vld [vmem:[%s1761_s1 + $0x28] sm:$0xff] }
   0x3   :  { %v1070_v5 = vpack.c.bf16 %v64_v4, %v63_v2  ;;  %v1074_v8 = vpack.c.bf16 %v66_v7, %v65_v6  ;;  %v45_v9 = vld [vmem:[%s1760_s0] sm:$0xff]  ;;  %v67_v10 = vld [vmem:[%s1761_s1 + $0x30] sm:$0xff]  ;;  %v68_v11 = vld [vmem:[%s1761_s1 + $0x38] sm:$0xff] }
   0x4   :  { %1067 = vmatprep.subr.bf16.mxu0 %v1066_v3  ;;  %890 = vmatprep.mubr.f32.mxu0 %v45_v9  ;;  %v1078_v12 = vpack.c.bf16 %v68_v11, %v67_v10  ;;  %v69_v13 = vld [vmem:[%s1761_s1 + $0x40] sm:$0xff]  ;;  %v70_v14 = vld [vmem:[%s1761_s1 + $0x48] sm:$0xff]  ;;  %v71_v16 = vld [vmem:[%s1761_s1 + $0x50] sm:$0xff] }
   0x5   :  { %1069 = vmatpush3.bf16.msra.mxu0 %v1066_v3  ;;  %v1082_v15 = vpack.c.bf16 %v70_v14, %v69_v13  ;;  %v72_v17 = vld [vmem:[%s1761_s1 + $0x58] sm:$0xff]  ;;  %v1405_v18 = vld [vmem:[%s1763_s3] sm:$0xff]  ;;  %v250_v22 = vld [vmem:[%s1764_s4 + $0x8] sm:$0xff] }
   0x6   :  { %1071 = vmatprep.subr.bf16.mxu0 %v1070_v5  ;;  %v1086_v19 = vpack.c.bf16 %v72_v17, %v71_v16  ;;  %v73_v20 = vld [vmem:[%s1761_s1 + $0x60] sm:$0xff]  ;;  %946 = vmatprep.mubr.f32.mxu1 %v1405_v18  ;;  %v74_v23 = vld [vmem:[%s1761_s1 + $0x68] sm:$0xff]  ;;  %v251_v25 = vld [vmem:[%s1764_s4 + $0x10] sm:$0xff] }
   0x7   :  { %v249_v21 = vld [vmem:[%s1764_s4] sm:$0xff]  ;;  %v252_v26 = vld [vmem:[%s1764_s4 + $0x18] sm:$0xff]  ;;  %v254_v29 = vld [vmem:[%s1764_s4 + $0x28] sm:$0xff]  ;;  %v1090_v30 = vpack.c.bf16 %v74_v23, %v73_v20 }
   0x8   :  { %v1098_v24 = vpack.c.bf16 %v250_v22, %v249_v21  ;;  %v1102_v27 = vpack.c.bf16 %v252_v26, %v251_v25  ;;  %v253_v28 = vld [vmem:[%s1764_s4 + $0x20] sm:$0xff]  ;;  %v75_v31 = vld [vmem:[%s1761_s1 + $0x70] sm:$0xff]  ;;  %v76_v32 = vld [vmem:[%s1761_s1 + $0x78] sm:$0xff] }
   0x9   :  { %1073 = vmatpush3.bf16.msra.mxu0 %v1070_v5  ;;  %v1106_v33 = vpack.c.bf16 %v254_v29, %v253_v28 }
   0xa   :  { %1075 = vmatprep.subr.bf16.mxu0 %v1074_v8  ;;  %1099 = vmatprep.subr.bf16.mxu1 %v1098_v24 }
   0xb   :  { %1101 = vmatpush3.bf16.msra.mxu1 %v1098_v24 }
   0xc   :  { %1103 = vmatprep.subr.bf16.mxu1 %v1102_v27 }
   0xd   :  { %1077 = vmatpush3.bf16.msra.mxu0 %v1074_v8 }
   0xe   :  { %1079 = vmatprep.subr.bf16.mxu0 %v1078_v12 }
  0x11   :  { %1081 = vmatpush3.bf16.msra.mxu0 %v1078_v12 }
  0x12   :  { %1083 = vmatprep.subr.bf16.mxu0 %v1082_v15 }
  0x15   :  { %1085 = vmatpush3.bf16.msra.mxu0 %v1082_v15 }
  0x16   :  { %1087 = vmatprep.subr.bf16.mxu0 %v1086_v19 }
  0x17   :  { %20 = vsyncpa [#allocation3], 0  ;;  %v255_v34 = vld [vmem:[%s1764_s4 + $0x30] sm:$0xff]  ;;  %v256_v35 = vld [vmem:[%s1764_s4 + $0x38] sm:$0xff]  ;;  %v1094_v36 = vpack.c.bf16 %v76_v32, %v75_v31  ;;  %1105 = vmatpush3.bf16.msra.mxu1 %v1102_v27 }
  0x18   :  { %v361_v37 = vld [vmem:[%s1766_s6] sm:$0xff]  ;;  %v362_v38 = vld [vmem:[%s1766_s6 + $0x8] sm:$0xff]  ;;  %1107 = vmatprep.subr.bf16.mxu1 %v1106_v33  ;;  %v1110_v39 = vpack.c.bf16 %v256_v35, %v255_v34  ;;  %v363_v43 = vld [vmem:[%s1766_s6 + $0x10] sm:$0xff] }
  0x19   :  { %1089 = vmatpush3.bf16.msra.mxu0 %v1086_v19  ;;  %v257_v40 = vld [vmem:[%s1764_s4 + $0x40] sm:$0xff]  ;;  %v258_v41 = vld [vmem:[%s1764_s4 + $0x48] sm:$0xff]  ;;  %v1130_v42 = vpack.c.bf16 %v362_v38, %v361_v37  ;;  %v364_v44 = vld [vmem:[%s1766_s6 + $0x18] sm:$0xff] }
  0x1a   :  { %1091 = vmatprep.subr.bf16.mxu0 %v1090_v30  ;;  %v1114_v45 = vpack.c.bf16 %v258_v41, %v257_v40  ;;  %v259_v46 = vld [vmem:[%s1764_s4 + $0x50] sm:$0xff]  ;;  %v260_v47 = vld [vmem:[%s1764_s4 + $0x58] sm:$0xff]  ;;  %v46_v48 = vld [vmem:[%s1760_s0 + $0x8] sm:$0xff]  ;;  %v1134_v50 = vpack.c.bf16 %v364_v44, %v363_v43 }
  0x1b   :  { %1109 = vmatpush3.bf16.msra.mxu1 %v1106_v33  ;;  %v47_v49 = vld [vmem:[%s1760_s0 + $0x10] sm:$0xff]  ;;  %v365_v51 = vld [vmem:[%s1766_s6 + $0x20] sm:$0xff]  ;;  %v366_v52 = vld [vmem:[%s1766_s6 + $0x28] sm:$0xff]  ;;  %v1118_v53 = vpack.c.bf16 %v260_v47, %v259_v46 }
  0x1c   :  { %1111 = vmatprep.subr.bf16.mxu1 %v1110_v39  ;;  %v261_v54 = vld [vmem:[%s1764_s4 + $0x60] sm:$0xff]  ;;  %v262_v55 = vld [vmem:[%s1764_s4 + $0x68] sm:$0xff]  ;;  %v48_v56 = vld [vmem:[%s1760_s0 + $0x18] sm:$0xff]  ;;  %v1138_v58 = vpack.c.bf16 %v366_v52, %v365_v51 }
  0x1d   :  { %1093 = vmatpush3.bf16.msra.mxu0 %v1090_v30  ;;  %v49_v57 = vld [vmem:[%s1760_s0 + $0x20] sm:$0xff]  ;;  %v367_v59 = vld [vmem:[%s1766_s6 + $0x30] sm:$0xff]  ;;  %v368_v60 = vld [vmem:[%s1766_s6 + $0x38] sm:$0xff]  ;;  %v1122_v61 = vpack.c.bf16 %v262_v55, %v261_v54 }
  0x1e   :  { %1095 = vmatprep.subr.bf16.mxu0 %v1094_v36  ;;  %v50_v62 = vld [vmem:[%s1760_s0 + $0x28] sm:$0xff]  ;;  %v51_v63 = vld [vmem:[%s1760_s0 + $0x30] sm:$0xff]  ;;  %v1142_v0 = vpack.c.bf16 %v368_v60, %v367_v59  ;;  %v369_v1 = vld [vmem:[%s1766_s6 + $0x40] sm:$0xff] }
  0x1f   :  { %1113 = vmatpush3.bf16.msra.mxu1 %v1110_v39  ;;  %v370_v2 = vld [vmem:[%s1766_s6 + $0x48] sm:$0xff]  ;;  %v52_v3 = vld [vmem:[%s1760_s0 + $0x38] sm:$0xff]  ;;  %v53_v4 = vld [vmem:[%s1760_s0 + $0x40] sm:$0xff] }
  0x20   :  { %1115 = vmatprep.subr.bf16.mxu1 %v1114_v45  ;;  %v1146_v5 = vpack.c.bf16 %v370_v2, %v369_v1  ;;  %v371_v6 = vld [vmem:[%s1766_s6 + $0x50] sm:$0xff]  ;;  %v372_v7 = vld [vmem:[%s1766_s6 + $0x58] sm:$0xff]  ;;  %v54_v8 = vld [vmem:[%s1760_s0 + $0x48] sm:$0xff] }
  0x21   :  { %1097 = vmatpush3.bf16.msra.mxu0 %v1094_v36  ;;  %v55_v9 = vld [vmem:[%s1760_s0 + $0x50] sm:$0xff]  ;;  %v1150_v10 = vpack.c.bf16 %v372_v7, %v371_v6  ;;  %v373_v11 = vld [vmem:[%s1766_s6 + $0x60] sm:$0xff]  ;;  %v374_v12 = vld [vmem:[%s1766_s6 + $0x68] sm:$0xff] }
  0x22   :  { %1131 = vmatprep.subr.bf16.mxu0 %v1130_v42  ;;  %v56_v13 = vld [vmem:[%s1760_s0 + $0x58] sm:$0xff]  ;;  %v57_v14 = vld [vmem:[%s1760_s0 + $0x60] sm:$0xff]  ;;  %v1154_v15 = vpack.c.bf16 %v374_v12, %v373_v11  ;;  %v375_v16 = vld [vmem:[%s1766_s6 + $0x70] sm:$0xff] }
  0x23   :  { %1117 = vmatpush3.bf16.msra.mxu1 %v1114_v45  ;;  %v376_v17 = vld [vmem:[%s1766_s6 + $0x78] sm:$0xff]  ;;  %v58_v19 = vld [vmem:[%s1760_s0 + $0x68] sm:$0xff]  ;;  %v59_v20 = vld [vmem:[%s1760_s0 + $0x70] sm:$0xff] }
  0x24   :  { %891 = vmatmul.mubr.f32.vlgmr.msra.gmra.mrb[0].mxu0 %v46_v48  ;;  %1119 = vmatprep.subr.bf16.mxu1 %v1118_v53  ;;  %v1158_v21 = vpack.c.bf16 %v376_v17, %v375_v16  ;;  %v60_v22 = vld [vmem:[%s1760_s0 + $0x78] sm:$0xff]  ;;  %v246_v23 = vld [vmem:[%s1763_s3 + $0x8] sm:$0xff]  ;;  %v247_v24 = vld [vmem:[%s1763_s3 + $0x10] sm:$0xff] }
  0x25   :  { %1133 = vmatpush3.bf16.msra.mxu0 %v1130_v42  ;;  %893 = vmatprep.mubr.f32.mxu0 %v47_v49  ;;  %v248_v25 = vld [vmem:[%s1763_s3 + $0x18] sm:$0xff]  ;;  %v263_v26 = vld [vmem:[%s1764_s4 + $0x70] sm:$0xff]  ;;  %v473_v28 = vld [vmem:[%s1768_s8] sm:$0xff] }
  0x26   :  { %1135 = vmatprep.subr.bf16.mxu0 %v1134_v50  ;;  %v474_v29 = vld [vmem:[%s1768_s8 + $0x8] sm:$0xff]  ;;  %v475_v31 = vld [vmem:[%s1768_s8 + $0x10] sm:$0xff]  ;;  %v476_v32 = vld [vmem:[%s1768_s8 + $0x18] sm:$0xff] }
  0x27   :  { %1121 = vmatpush3.bf16.msra.mxu1 %v1118_v53  ;;  %v1162_v30 = vpack.c.bf16 %v474_v29, %v473_v28  ;;  %v1166_v33 = vpack.c.bf16 %v476_v32, %v475_v31  ;;  %v477_v34 = vld [vmem:[%s1768_s8 + $0x20] sm:$0xff]  ;;  %v478_v35 = vld [vmem:[%s1768_s8 + $0x28] sm:$0xff]  ;;  %v479_v37 = vld [vmem:[%s1768_s8 + $0x30] sm:$0xff] }
  0x28   :  { %894 = vmatmul.mubr.f32.gmra.mrb[2].mxu0 %v48_v56  ;;  %1123 = vmatprep.subr.bf16.mxu1 %v1122_v61  ;;  %v1170_v36 = vpack.c.bf16 %v478_v35, %v477_v34  ;;  %v480_v38 = vld [vmem:[%s1768_s8 + $0x38] sm:$0xff]  ;;  %v481_v40 = vld [vmem:[%s1768_s8 + $0x40] sm:$0xff]  ;;  %v482_v41 = vld [vmem:[%s1768_s8 + $0x48] sm:$0xff] }
  0x29   :  { %1137 = vmatpush3.bf16.msra.mxu0 %v1134_v50  ;;  %896 = vmatprep.mubr.f32.mxu0 %v49_v57  ;;  %v1174_v39 = vpack.c.bf16 %v480_v38, %v479_v37  ;;  %v1178_v42 = vpack.c.bf16 %v482_v41, %v481_v40  ;;  %v483_v43 = vld [vmem:[%s1768_s8 + $0x50] sm:$0xff]  ;;  %v484_v44 = vld [vmem:[%s1768_s8 + $0x58] sm:$0xff]  ;;  %v485_v46 = vld [vmem:[%s1768_s8 + $0x60] sm:$0xff] }
  0x2a   :  { %1139 = vmatprep.subr.bf16.mxu0 %v1138_v58  ;;  %v1182_v45 = vpack.c.bf16 %v484_v44, %v483_v43  ;;  %v486_v47 = vld [vmem:[%s1768_s8 + $0x68] sm:$0xff]  ;;  %v487_v49 = vld [vmem:[%s1768_s8 + $0x70] sm:$0xff]  ;;  %v488_v50 = vld [vmem:[%s1768_s8 + $0x78] sm:$0xff] }
  0x2b   :  { %1125 = vmatpush3.bf16.msra.mxu1 %v1122_v61  ;;  %v1186_v48 = vpack.c.bf16 %v486_v47, %v485_v46  ;;  %v1190_v51 = vpack.c.bf16 %v488_v50, %v487_v49  ;;  %v585_v52 = vld [vmem:[%s1770_s10] sm:$0xff]  ;;  %v586_v53 = vld [vmem:[%s1770_s10 + $0x8] sm:$0xff]  ;;  %v587_v54 = vld [vmem:[%s1770_s10 + $0x10] sm:$0xff] }
  0x2c   :  { %897 = vmatmul.mubr.f32.gmra.mrb[4].mxu0 %v50_v62  ;;  %v1628_v55 = vpack.c.bf16 %v586_v53, %v585_v52  ;;  %v588_v56 = vld [vmem:[%s1770_s10 + $0x18] sm:$0xff]  ;;  %v590_v59 = vld [vmem:[%s1770_s10 + $0x28] sm:$0xff]  ;;  %v591_v61 = vld [vmem:[%s1770_s10 + $0x30] sm:$0xff] }
  0x2d   :  { %1141 = vmatpush3.bf16.msra.mxu0 %v1138_v58  ;;  %899 = vmatprep.mubr.f32.mxu0 %v51_v63  ;;  %v1633_v57 = vpack.c.bf16 %v588_v56, %v587_v54  ;;  %v589_v58 = vld [vmem:[%s1770_s10 + $0x20] sm:$0xff]  ;;  %v592_v62 = vld [vmem:[%s1770_s10 + $0x38] sm:$0xff]  ;;  %v594_v1 = vld [vmem:[%s1770_s10 + $0x48] sm:$0xff] }
  0x2e   :  { %1143 = vmatprep.subr.bf16.mxu0 %v1142_v0  ;;  %v1645_v60 = vpack.c.bf16 %v590_v59, %v589_v58  ;;  %v1655_v63 = vpack.c.bf16 %v592_v62, %v591_v61  ;;  %v597_v6 = vld [vmem:[%s1770_s10 + $0x60] sm:$0xff]  ;;  %v598_v7 = vld [vmem:[%s1770_s10 + $0x68] sm:$0xff] }
  0x30   :  { %900 = vmatmul.mubr.f32.gmra.mrb[6].mxu0 %v52_v3  ;;  %v595_v3 = vld [vmem:[%s1770_s10 + $0x50] sm:$0xff] }
  0x31   :  { %1145 = vmatpush3.bf16.msra.mxu0 %v1142_v0  ;;  %902 = vmatprep.mubr.f32.mxu0 %v53_v4  ;;  %v593_v0 = vld [vmem:[%s1770_s10 + $0x40] sm:$0xff]  ;;  %v596_v4 = vld [vmem:[%s1770_s10 + $0x58] sm:$0xff] }
  0x32   :  { %1147 = vmatprep.subr.bf16.mxu0 %v1146_v5  ;;  %v1665_v2 = vpack.c.bf16 %v594_v1, %v593_v0  ;;  %v599_v0 = vld [vmem:[%s1770_s10 + $0x70] sm:$0xff]  ;;  %v600_v1 = vld [vmem:[%s1770_s10 + $0x78] sm:$0xff]  ;;  %s1285_s10 = smov [#allocation2]  }
  0x34   :  { %903 = vmatmul.mubr.f32.gmra.mrb[8].mxu0 %v54_v8  ;;  %v1685_v8 = vpack.c.bf16 %v598_v7, %v597_v6 }
  0x35   :  { %1149 = vmatpush3.bf16.msra.mxu0 %v1146_v5  ;;  %905 = vmatprep.mubr.f32.mxu0 %v55_v9  ;;  %v1675_v5 = vpack.c.bf16 %v596_v4, %v595_v3  ;;  %v741_v9 = vld [vmem:[%s1762_s2] ss:$0 sm:$0xff] }
  0x36   :  { %1151 = vmatprep.subr.bf16.mxu0 %v1150_v10  ;;  %v744_v3 = vld [vmem:[%s1769_s9] ss:$0 sm:$0xff] }
  0x38   :  { %906 = vmatmul.mubr.f32.gmra.mrb[10].mxu0 %v56_v13 }
  0x39   :  { %1153 = vmatpush3.bf16.msra.mxu0 %v1150_v10  ;;  %908 = vmatprep.mubr.f32.mxu0 %v57_v14 }
  0x3a   :  { %1155 = vmatprep.subr.bf16.mxu0 %v1154_v15 }
  0x3c   :  { %909 = vmatmul.mubr.f32.gmra.mrb[12].mxu0 %v58_v19 }
  0x3d   :  { %1157 = vmatpush3.bf16.msra.mxu0 %v1154_v15  ;;  %911 = vmatprep.mubr.f32.mxu0 %v59_v20 }
  0x3e   :  { %1159 = vmatprep.subr.bf16.mxu0 %v1158_v21 }
  0x40   :  { %912 = vmatmul.mubr.f32.gmra.mrb[14].mxu0 %v60_v22 }
  0x41   :  { %1161 = vmatpush3.bf16.msra.mxu0 %v1158_v21  ;;  %984 = vmatprep.mubr.f32.mxu0 %v1405_v18  ;;  %v264_v18 = vld [vmem:[%s1764_s4 + $0x78] sm:$0xff] }
  0x42   :  { %v1126_v27 = vpack.c.bf16 %v264_v18, %v263_v26  ;;  %1195 = vmatprep.subr.bf16.mxu0 %v1628_v55 }
  0x44   :  { %985 = vmatmul.mubr.f32.vlgmr.msra.gmra.mrb[16].mxu0 %v246_v23  ;;  %1127 = vmatprep.subr.bf16.mxu1 %v1126_v27 }
  0x45   :  { %987 = vmatprep.mubr.f32.mxu0 %v247_v24  ;;  %1129 = vmatpush3.bf16.msra.mxu1 %v1126_v27 }
  0x46   :  { %1163 = vmatprep.subr.bf16.mxu1 %v1162_v30  ;;  %1197 = vmatpush3.bf16.msra.mxu0 %v1628_v55 }
  0x47   :  { %1199 = vmatprep.subr.bf16.mxu0 %v1633_v57 }
  0x48   :  { %988 = vmatmul.mubr.f32.gmra.mrb[18].mxu0 %v248_v25  ;;  %947 = vmatmul.mubr.f32.vlgmr.msra.gmra.mrb[0].mxu1 %v246_v23 }
  0x49   :  { %1165 = vmatpush3.bf16.msra.mxu1 %v1162_v30  ;;  %949 = vmatprep.mubr.f32.mxu1 %v247_v24 }
  0x4a   :  { %1167 = vmatprep.subr.bf16.mxu1 %v1166_v33  ;;  %1201 = vmatpush3.bf16.msra.mxu0 %v1633_v57 }
  0x4b   :  { %1203 = vmatprep.subr.bf16.mxu0 %v1645_v60 }
  0x4c   :  { %950 = vmatmul.mubr.f32.gmra.mrb[2].mxu1 %v248_v25 }
  0x4d   :  { %1169 = vmatpush3.bf16.msra.mxu1 %v1166_v33 }
  0x4e   :  { %1171 = vmatprep.subr.bf16.mxu1 %v1170_v36  ;;  %1205 = vmatpush3.bf16.msra.mxu0 %v1645_v60 }
  0x4f   :  { %1207 = vmatprep.subr.bf16.mxu0 %v1655_v63 }
  0x51   :  { %1173 = vmatpush3.bf16.msra.mxu1 %v1170_v36 }
  0x52   :  { %1175 = vmatprep.subr.bf16.mxu1 %v1174_v39  ;;  %1209 = vmatpush3.bf16.msra.mxu0 %v1655_v63 }
  0x53   :  { %1211 = vmatprep.subr.bf16.mxu0 %v1665_v2 }
  0x55   :  { %1177 = vmatpush3.bf16.msra.mxu1 %v1174_v39 }
  0x56   :  { %1179 = vmatprep.subr.bf16.mxu1 %v1178_v42  ;;  %1213 = vmatpush3.bf16.msra.mxu0 %v1665_v2 }
  0x57   :  { %1215 = vmatprep.subr.bf16.mxu0 %v1675_v5 }
  0x59   :  { %1181 = vmatpush3.bf16.msra.mxu1 %v1178_v42  ;;  %v743_v42 = vld [vmem:[%s1767_s7] ss:$0 sm:$0xff] }
  0x5a   :  { %1183 = vmatprep.subr.bf16.mxu1 %v1182_v45  ;;  %1217 = vmatpush3.bf16.msra.mxu0 %v1675_v5 }
  0x5b   :  { %1219 = vmatprep.subr.bf16.mxu0 %v1685_v8 }
  0x5d   :  { %1185 = vmatpush3.bf16.msra.mxu1 %v1182_v45 }
  0x5e   :  { %1187 = vmatprep.subr.bf16.mxu1 %v1186_v48  ;;  %1221 = vmatpush3.bf16.msra.mxu0 %v1685_v8 }
  0x61   :  { %1189 = vmatpush3.bf16.msra.mxu1 %v1186_v48 }
  0x62   :  { %1191 = vmatprep.subr.bf16.mxu1 %v1190_v51 }
  0x65   :  { %1193 = vmatpush3.bf16.msra.mxu1 %v1190_v51 }
  0x66   :  { %1226 = vmatprep.subr.bf16.mxu1 %v1628_v55 }
  0xf7   :  { %v892_v10 = vpop.f32.mrb[0].mxu0 }
  0xf8   :  { %v156_v11 = vadd.f32 %v892_v10, %v741_v9  ;;  %v150_v12 = vpop.f32.mrb[1].mxu0 }
  0xf9   :  { %v151_v13 = vadd.f32 %v741_v9, %v150_v12 }
  0xfa   :  { %230 = vst [vmem:[#allocation2 + $0x8] sm:$0xff] %v156_v11 }
  0xfb   :  { %229 = vst [vmem:[#allocation2] sm:$0xff] %v151_v13  ;;  %v895_v14 = vpop.f32.mrb[2].mxu0 }
  0xfc   :  { %v166_v15 = vadd.f32 %v895_v14, %v741_v9  ;;  %v160_v16 = vpop.f32.mrb[3].mxu0 }
  0xfd   :  { %v161_v17 = vadd.f32 %v741_v9, %v160_v16 }
  0xfe   :  { %232 = vst [vmem:[#allocation2 + $0x18] sm:$0xff] %v166_v15 }
  0xff   :  { %231 = vst [vmem:[#allocation2 + $0x10] sm:$0xff] %v161_v17  ;;  %v898_v19 = vpop.f32.mrb[4].mxu0 }
 0x100   :  { %v176_v20 = vadd.f32 %v898_v19, %v741_v9  ;;  %v170_v21 = vpop.f32.mrb[5].mxu0 }
 0x101   :  { %v171_v22 = vadd.f32 %v741_v9, %v170_v21 }
 0x102   :  { %234 = vst [vmem:[#allocation2 + $0x28] sm:$0xff] %v176_v20 }
 0x103   :  { %233 = vst [vmem:[#allocation2 + $0x20] sm:$0xff] %v171_v22  ;;  %v901_v23 = vpop.f32.mrb[6].mxu0 }
 0x104   :  { %v186_v24 = vadd.f32 %v901_v23, %v741_v9  ;;  %v180_v25 = vpop.f32.mrb[7].mxu0 }
 0x105   :  { %v181_v26 = vadd.f32 %v741_v9, %v180_v25 }
 0x106   :  { %236 = vst [vmem:[#allocation2 + $0x38] sm:$0xff] %v186_v24 }
 0x107   :  { %235 = vst [vmem:[#allocation2 + $0x30] sm:$0xff] %v181_v26  ;;  %v904_v18 = vpop.f32.mrb[8].mxu0 }
 0x108   :  { %v196_v27 = vadd.f32 %v904_v18, %v741_v9  ;;  %v190_v28 = vpop.f32.mrb[9].mxu0 }
 0x109   :  { %v191_v29 = vadd.f32 %v741_v9, %v190_v28 }
 0x10a   :  { %238 = vst [vmem:[#allocation2 + $0x48] sm:$0xff] %v196_v27 }
 0x10b   :  { %237 = vst [vmem:[#allocation2 + $0x40] sm:$0xff] %v191_v29  ;;  %v907_v30 = vpop.f32.mrb[10].mxu0 }
 0x10c   :  { %v206_v31 = vadd.f32 %v907_v30, %v741_v9  ;;  %v200_v32 = vpop.f32.mrb[11].mxu0 }
 0x10d   :  { %v201_v33 = vadd.f32 %v741_v9, %v200_v32 }
 0x10e   :  { %240 = vst [vmem:[#allocation2 + $0x58] sm:$0xff] %v206_v31 }
 0x10f   :  { %239 = vst [vmem:[#allocation2 + $0x50] sm:$0xff] %v201_v33  ;;  %v910_v34 = vpop.f32.mrb[12].mxu0 }
 0x110   :  { %v216_v35 = vadd.f32 %v910_v34, %v741_v9  ;;  %v210_v36 = vpop.f32.mrb[13].mxu0 }
 0x111   :  { %v211_v37 = vadd.f32 %v741_v9, %v210_v36 }
 0x112   :  { %242 = vst [vmem:[#allocation2 + $0x68] sm:$0xff] %v216_v35 }
 0x113   :  { %241 = vst [vmem:[#allocation2 + $0x60] sm:$0xff] %v211_v37  ;;  %v913_v38 = vpop.f32.mrb[14].mxu0 }
 0x114   :  { %v226_v39 = vadd.f32 %v913_v38, %v741_v9  ;;  %v220_v40 = vpop.f32.mrb[15].mxu0 }
 0x115   :  { %v221_v41 = vadd.f32 %v741_v9, %v220_v40 }
 0x116   :  { %244 = vst [vmem:[#allocation2 + $0x78] sm:$0xff] %v226_v39 }
 0x117   :  { %243 = vst [vmem:[#allocation2 + $0x70] sm:$0xff] %v221_v41  ;;  %v986_v43 = vpop.f32.mrb[16].mxu0 }
 0x118   :  { %v456_v44 = vadd.f32 %v986_v43, %v743_v42  ;;  %v450_v45 = vpop.f32.mrb[17].mxu0 }
 0x119   :  { %v451_v46 = vadd.f32 %v743_v42, %v450_v45 }
 0x11a   :  { %v470_v49 = vmax.f32 %v456_v44, 0.0 }
 0x11b   :  { %v469_v47 = vmax.f32 %v451_v46, 0.0  ;;  %v989_v48 = vpop.f32.mrb[18].mxu0  ;;  %v948_v56 = vpop.f32.mrb[0].mxu1 }
 0x11c   :  { %v466_v50 = vadd.f32 %v989_v48, %v743_v42  ;;  %v460_v51 = vpop.f32.mrb[19].mxu0  ;;  %v338_v58 = vpop.f32.mrb[1].mxu1 }
 0x11d   :  { %v461_v52 = vadd.f32 %v743_v42, %v460_v51  ;;  %1022 = vmatprep.mubr.f32.mxu1 %v469_v47 }
 0x11e   :  { %1023 = vmatmul.mubr.f32.vlgmr.msra.gmra.mrb[4].mxu1 %v470_v49  ;;  %v472_v54 = vmax.f32 %v466_v50, 0.0 }
 0x11f   :  { %v471_v53 = vmax.f32 %v461_v52, 0.0  ;;  %1234 = vmatpush3.bf16.msra.mxu1 %v1628_v55  ;;  %v742_v55 = vld [vmem:[%s1765_s5] ss:$0 sm:$0xff] }
 0x120   :  { %1227 = vmatprep.subr.bf16.mxu1 %v1633_v57  ;;  %v339_v59 = vadd.f32 %v742_v55, %v338_v58 }
 0x121   :  { %1025 = vmatprep.mubr.f32.mxu1 %v471_v53 }
 0x122   :  { %1026 = vmatmul.mubr.f32.gmra.mrb[6].mxu1 %v472_v54  ;;  %357 = vst [vmem:[%s1773_s13] sm:$0xff] %v339_v59 }
 0x123   :  { %1235 = vmatpush3.bf16.msra.mxu1 %v1633_v57  ;;  %v344_v57 = vadd.f32 %v948_v56, %v742_v55 }
 0x124   :  { %1228 = vmatprep.subr.bf16.mxu1 %v1645_v60 }
 0x125   :  { %358 = vst [vmem:[%s1773_s13 + $0x8] sm:$0xff] %v344_v57 }
 0x127   :  { %1236 = vmatpush3.bf16.msra.mxu1 %v1645_v60  ;;  %v951_v60 = vpop.f32.mrb[2].mxu1 }
 0x128   :  { %1229 = vmatprep.subr.bf16.mxu1 %v1655_v63  ;;  %v354_v61 = vadd.f32 %v951_v60, %v742_v55  ;;  %v348_v62 = vpop.f32.mrb[3].mxu1 }
 0x12a   :  { %360 = vst [vmem:[%s1773_s13 + $0x18] sm:$0xff] %v354_v61 }
 0x12b   :  { %1237 = vmatpush3.bf16.msra.mxu1 %v1655_v63  ;;  %v349_v63 = vadd.f32 %v742_v55, %v348_v62 }
 0x12c   :  { %1230 = vmatprep.subr.bf16.mxu1 %v1665_v2 }
 0x12d   :  { %359 = vst [vmem:[%s1773_s13 + $0x10] sm:$0xff] %v349_v63  ;;  %s722_s13 = sshll.u32 %s1285_s10, 4  ;;  %s723_s13 = int_to_ptr.vmem [resolvable:$true] %s722_s13 }
 0x12e   :  { %s1261_s9 = scalar_lea.vmem %s723_s13, 2048  ;;  %p1266_p1 = scmp.lt.s32.totalorder %s723_s13, %s723_s13 }
 0x12f   :  { %1238 = vmatpush3.bf16.msra.mxu1 %v1665_v2  ;;  %v1222_v2 = vpack.c.bf16 %v600_v1, %v599_v0  ;;  %p1262_p0 = scmp.ne.s32.totalorder %s723_s13, %s1261_s9  ;;  %p1267_p2 = scmp.lt.s32.totalorder %s1261_s9, %s1261_s9 }
 0x130   :  { %1231 = vmatprep.subr.bf16.mxu1 %v1675_v5 }
 0x131   :  { %1223 = vmatprep.subr.bf16.mxu0 %v1222_v2  ;;  %p1268_p3 = por %p1267_p2, %p1266_p1 }
 0x132   :  { %1225 = vmatpush3.bf16.msra.mxu0 %v1222_v2 }
 0x133   :  { %1239 = vmatpush3.bf16.msra.mxu1 %v1675_v5  ;;  %p1269_p4 = pnand %p1268_p3, %p1262_p0 }
 0x134   :  { %1232 = vmatprep.subr.bf16.mxu1 %v1685_v8 }
 0x137   :  { %1240 = vmatpush3.bf16.msra.mxu1 %v1685_v8 }
 0x138   :  { %1233 = vmatprep.subr.bf16.mxu1 %v1222_v2 }
 0x13b   :  { %1241 = vmatpush3.bf16.msra.mxu1 %v1222_v2 }
 0x1f1   :  { %v1024_v4 = vpop.f32.mrb[4].mxu1 }
 0x1f2   :  { %v568_v5 = vadd.f32 %v1024_v4, %v744_v3  ;;  %v562_v6 = vpop.f32.mrb[5].mxu1 }
 0x1f3   :  { %v563_v7 = vadd.f32 %v744_v3, %v562_v6 }
 0x1f4   :  { %v582_v10 = vmax.f32 %v568_v5, 0.0 }
 0x1f5   :  { %v581_v8 = vmax.f32 %v563_v7, 0.0  ;;  %v1027_v9 = vpop.f32.mrb[6].mxu1 }
 0x1f6   :  { %v578_v11 = vadd.f32 %v1027_v9, %v744_v3  ;;  %v572_v12 = vpop.f32.mrb[7].mxu1 }
 0x1f7   :  { %v573_v13 = vadd.f32 %v744_v3, %v572_v12  ;;  %1060 = vmatprep.mubr.f32.mxu0 %v581_v8 }
 0x1f8   :  { %1061 = vmatmul.mubr.f32.vlgmr.msra.gmra.mrb[20].mxu0 %v582_v10  ;;  %v584_v15 = vmax.f32 %v578_v11, 0.0 }
 0x1f9   :  { %v583_v14 = vmax.f32 %v573_v13, 0.0 }
 0x1fb   :  { %1063 = vmatprep.mubr.f32.mxu1 %v583_v14 }
 0x1fc   :  { %1064 = vmatmul.mubr.f32.vlgmr.msra.gmra.mrb[8].mxu1 %v584_v15 }
 0x1fd   :  { %1272 = shalt.err (!%p1269_p4)
}
 0x1fe   :  { %s1273_s24 = scalar_lea.hbm %s1772_s12, 2048 }
 0x1ff   :  { %p1274_p5 = scmp.ne.s32.totalorder %s1772_s12, %s1273_s24  ;;  %p1277_p6 = scmp.lt.u32.totalorder %s1273_s24, %s1772_s12 }
 0x201   :  { %p1279_p7 = pnand %p1277_p6, %p1274_p5 }
 0x203   :  { %1282 = shalt.err (!%p1279_p7)
}
 0x204   :  { %s1286_s2 = smov 128   ;;  %s1287_s8 = smov 8   ;;  %v745_v16 = vld [vmem:[%s1771_s11] ss:$0 sm:$0xff] }
 0x205   :  { %728 = dma.vmem_to_hbm [thread:$0]  %s723_s13, 2048, %s1772_s12, [#allocation3], %s1286_s2, %s1286_s2, %s1287_s8  }
 0x2cb   :  { %v1062_v17 = vpop.f32.mrb[20].mxu0 }
 0x2cc   :  { %v680_v19 = vadd.f32 %v1062_v17, %v745_v16  ;;  %v674_v20 = vpop.f32.mrb[21].mxu0 }
 0x2cd   :  { %v675_v21 = vadd.f32 %v745_v16, %v674_v20 }
 0x2ce   :  { %v694_v22 = vsub.f32 0.0, %v680_v19 }
 0x2cf   :  { %v693_v23 = vsub.f32 0.0, %v675_v21  ;;  %v1065_v24 = vpop.f32.mrb[8].mxu1 }
 0x2d0   :  { %v699_v25 = vmul.f32 1.442695, %v694_v22  ;;  %v690_v26 = vadd.f32 %v1065_v24, %v745_v16  ;;  %v684_v18 = vpop.f32.mrb[9].mxu1 }
 0x2d1   :  { %v697_v27 = vmul.f32 1.442695, %v693_v23  ;;  %v685_v28 = vadd.f32 %v745_v16, %v684_v18 }
 0x2d2   :  { %1245 = vpow2.f32 %v699_v25  ;;  %v696_v29 = vsub.f32 0.0, %v690_v26 }
 0x2d3   :  { %1247 = vpow2.f32 %v697_v27  ;;  %v695_v30 = vsub.f32 0.0, %v685_v28 }
 0x2d4   :  { %v703_v31 = vmul.f32 1.442695, %v696_v29 }
 0x2d5   :  { %v701_v32 = vmul.f32 1.442695, %v695_v30 }
 0x2d6   :  { %1249 = vpow2.f32 %v703_v31 }
 0x2d7   :  { %1251 = vpow2.f32 %v701_v32 }
 0x2dc   :  { %v1246_v33 = vpop.eup %1245 }
 0x2dd   :  { %v1248_v34 = vpop.eup %1247  ;;  %v706_v35 = vadd.f32 1.0, %v1246_v33 }
 0x2de   :  { %v705_v36 = vadd.f32 1.0, %v1248_v34 }
 0x2df   :  { %1253 = vrcp.f32 %v706_v35 }
 0x2e0   :  { %v1250_v37 = vpop.eup %1249  ;;  %1255 = vrcp.f32 %v705_v36 }
 0x2e1   :  { %v1252_v38 = vpop.eup %1251  ;;  %v708_v39 = vadd.f32 1.0, %v1250_v37 }
 0x2e2   :  { %v707_v40 = vadd.f32 1.0, %v1252_v38 }
 0x2e3   :  { %1257 = vrcp.f32 %v708_v39 }
 0x2e4   :  { %1259 = vrcp.f32 %v707_v40 }
 0x2e9   :  { %v1254_v41 = vpop.eup %1253 }
 0x2ea   :  { %v1256_v42 = vpop.eup %1255  ;;  %714 = vst [vmem:[%s1774_s14 + $0x8] sm:$0xff] %v1254_v41 }
 0x2eb   :  { %713 = vst [vmem:[%s1774_s14] sm:$0xff] %v1256_v42 }
 0x2ed   :  { %v1258_v43 = vpop.eup %1257 }
 0x2ee   :  { %v1260_v44 = vpop.eup %1259  ;;  %716 = vst [vmem:[%s1774_s14 + $0x18] sm:$0xff] %v1258_v43 }
 0x2ef   :  { %715 = vst [vmem:[%s1774_s14 + $0x10] sm:$0xff] %v1260_v44 }
 0x2f0   :  { %1283 = dma.done.wait [#allocation3], 2048  }
 0x2f1   :  { %1284 = vsyncadd [#allocation3], 4294965248 }
 0x2f2   :  { %740 = vsyncpa [#allocation3], 1 }

</bundles_post_ra>
